<compile_context>
chip_gen: v7x
topology: tpu7x:2x2x1
jax: 0.10.0
libtpu: 0.0.40
codegen_flags: <defaults>
</compile_context>

<pallas_src>
import math

import jax
import jax.numpy as jnp
from jax.experimental import pallas as pl
from jax.experimental.pallas import tpu as pltpu


def _gelu_tanh(x):
    # PyTorch nn.GELU(approximate='tanh'):
    # 0.5 * x * (1 + tanh(sqrt(2/pi) * (x + 0.044715 * x^3)))
    c = math.sqrt(2.0 / math.pi)
    return 0.5 * x * (1.0 + jnp.tanh(c * (x + 0.044715 * x * x * x)))


def _round_up(v, m):
    return (v + m - 1) // m * m


# ----------------------------------------------------------------------------
# Kernel
# ----------------------------------------------------------------------------
def mlp_kernel(x_ref, w1_ref, w2_ref, o_ref, acc_ref):
    # x_ref:  (tm, C_in_p)   compute dtype (bf16)
    # w1_ref: (C_in_p, tk)   compute dtype  (slice of W1 along hidden)
    # w2_ref: (tk, C_out_p)  compute dtype  (slice of W2 along hidden)
    # o_ref:  (tm, C_out_p)  output dtype
    # acc_ref:(tm, C_out_p)  f32 accumulator, resident across the k axis
    k = pl.program_id(1)

    @pl.when(k == 0)
    def _():
        acc_ref[...] = jnp.zeros_like(acc_ref)

    # First matmul: bf16 operands, f32 accumulation on the MXU.
    h = jnp.dot(x_ref[...], w1_ref[...], preferred_element_type=jnp.float32)
    # GELU math in f32 for accuracy, cast back to the compute dtype so the
    # second matmul also runs at full bf16 MXU throughput.
    h = _gelu_tanh(h).astype(x_ref.dtype)
    acc_ref[...] += jnp.dot(h, w2_ref[...], preferred_element_type=jnp.float32)

    @pl.when(k == pl.num_programs(1) - 1)
    def _():
        o_ref[...] = acc_ref[...].astype(o_ref.dtype)


# ----------------------------------------------------------------------------
# Tile / VMEM heuristics
# ----------------------------------------------------------------------------
def _tpu_config():
    """Per-generation defaults: (tm_target, vmem_budget_bytes, num_tensorcores)."""
    kind = ""
    try:
        kind = jax.devices()[0].device_kind.lower()
    except Exception:
        pass
    if "v5" in kind and ("lite" in kind or "e" in kind):
        # v5e: 1 TC, 128 MiB VMEM, ridge ~240 FLOP/byte -> tm 256-512 suffices.
        return 384, 96 << 20, 1
    if "v6" in kind:
        # v6e: 1 TC, 128 MiB VMEM, ridge ~650 FLOP/byte -> large row tiles.
        return 1024, 100 << 20, 1
    if "v7" in kind or "7x" in kind:
        # v7x: 2 TCs, 64 MiB VMEM per TC, ridge ~310 FLOP/byte.
        return 512, 52 << 20, 2
    # Unknown hardware: conservative VMEM budget, allow a 2-way M split.
    return 512, 48 << 20, 2


def _pick_tk(h_p, cap=512):
    """Largest multiple of 128 (<= cap) that divides the padded hidden dim."""
    tk = 128
    for cand in range(128, min(cap, h_p) + 1, 128):
        if h_p % cand == 0:
            tk = cand
    return tk


def _shrink_tk(h_p, tk):
    for cand in range(tk - 128, 127, -128):
        if h_p % cand == 0:
            return cand
    return 128


def _vmem_footprint(tm, tk, c_in_p, c_out_p, cd_bytes, out_bytes):
    # Double-buffered input/output blocks + f32 accumulator scratch.
    return (2 * tm * c_in_p * cd_bytes          # x tile
            + 2 * c_in_p * tk * cd_bytes        # W1 tile
            + 2 * tk * c_out_p * cd_bytes       # W2 tile
            + 2 * tm * c_out_p * out_bytes      # output tile
            + tm * c_out_p * 4)                 # f32 accumulator


# ----------------------------------------------------------------------------
# Weight preparation (do ONCE at model init, reuse across forward calls)
# ----------------------------------------------------------------------------
def prepare_mlp_weights(fc1_weight, fc2_weight, compute_dtype=jnp.bfloat16):
    """Transpose, cast and lane-pad the nn.Linear weights once.

    fc1_weight: [hidden_features, in_features]
    fc2_weight: [out_features, hidden_features]
    """
    hidden, c_in = fc1_weight.shape
    c_out, hidden2 = fc2_weight.shape
    assert hidden2 == hidden

    c_in_p = _round_up(c_in, 128)
    c_out_p = _round_up(c_out, 128)
    h_p = _round_up(hidden, 128)

    # Zero padding is exact: padded input/hidden lanes contribute 0
    # (GELU(0) = 0); padded output lanes/rows are sliced off after the kernel.
    w1 = jnp.pad(fc1_weight.T.astype(compute_dtype),
                 ((0, c_in_p - c_in), (0, h_p - hidden)))      # (C_in_p, H_p)
    w2 = jnp.pad(fc2_weight.T.astype(compute_dtype),
                 ((0, h_p - hidden), (0, c_out_p - c_out)))    # (H_p, C_out_p)

    return {
        "w1": w1, "w2": w2,
        "c_in": c_in, "hidden": hidden, "c_out": c_out,
        "compute_dtype": compute_dtype,
    }


# ----------------------------------------------------------------------------
# Forward pass
# ----------------------------------------------------------------------------
def mlp_pallas_prepared(x, prepared, *, tm=None, tk=None, vmem_limit_bytes=None):
    """y = gelu_tanh(x @ W1^T) @ W2^T using pre-prepared (padded, bf16) weights."""
    w1 = prepared["w1"]
    w2 = prepared["w2"]
    c_in = prepared["c_in"]
    c_out = prepared["c_out"]
    compute_dtype = prepared["compute_dtype"]

    c_in_p, h_p = w1.shape
    c_out_p = w2.shape[1]

    orig_shape = x.shape
    assert orig_shape[-1] == c_in
    out_dtype = x.dtype

    x2d = x.reshape(-1, c_in).astype(compute_dtype)
    m = x2d.shape[0]

    tm_target, vmem_budget, num_tc = _tpu_config()
    if vmem_limit_bytes is not None:
        vmem_budget = vmem_limit_bytes

    # Row-tile granularity: MXU tile (256/128) when there are enough tokens,
    # falling back to 16 (bf16 sublane packing) for tiny token counts.
    g = 256 if m >= 512 else (128 if m >= 128 else 16)
    if tm is None:
        tm = tm_target
    tm = max(g, min(tm, _round_up(m, g)))
    tm = _round_up(tm, g)

    # Ensure the "parallel" M axis has >= num_tc tiles (v7x has 2 TensorCores).
    m_p = _round_up(m, tm)
    while num_tc > 1 and m_p // tm < num_tc and tm > g:
        tm = max(g, _round_up(tm // 2, g))
        m_p = _round_up(m, tm)

    # Hidden (reduction) tile: divides h_p exactly -> no wasted weight traffic.
    if tk is None:
        tk = _pick_tk(h_p)
    else:
        tk = min(_round_up(tk, 128), h_p)
        if h_p % tk != 0:
            tk = _pick_tk(h_p, cap=tk)

    cd_bytes = jnp.dtype(compute_dtype).itemsize
    out_bytes = jnp.dtype(out_dtype).itemsize

    # Shrink until the double-buffered working set fits the VMEM budget.
    # Shrink tk first (tm sets arithmetic intensity of the weight stream).
    while _vmem_footprint(tm, tk, c_in_p, c_out_p, cd_bytes, out_bytes) > vmem_budget:
        if tk > 128:
            tk = _shrink_tk(h_p, tk)
        elif tm > g:
            tm = max(g, _round_up(tm // 2, g))
        else:
            break
    m_p = _round_up(m, tm)

    footprint = _vmem_footprint(tm, tk, c_in_p, c_out_p, cd_bytes, out_bytes)
    vmem_limit = int(max(32 << 20,
                         min(vmem_budget, footprint + (8 << 20)),
                         footprint))

    x_pad = jnp.pad(x2d, ((0, m_p - m), (0, c_in_p - c_in)))

    grid = (m_p // tm, h_p // tk)

    out = pl.pallas_call(
        mlp_kernel,
        out_shape=jax.ShapeDtypeStruct((m_p, c_out_p), out_dtype),
        grid_spec=pltpu.PrefetchScalarGridSpec(
            num_scalar_prefetch=0,
            grid=grid,
            in_specs=[
                # Activations: constant across k (no re-DMA along the reduction).
                pl.BlockSpec((tm, c_in_p), lambda i, k: (i, 0)),
                # Weight tiles stream along the hidden (reduction) axis.
                pl.BlockSpec((c_in_p, tk), lambda i, k: (0, k)),
                pl.BlockSpec((tk, c_out_p), lambda i, k: (k, 0)),
            ],
            out_specs=pl.BlockSpec((tm, c_out_p), lambda i, k: (i, 0)),
            scratch_shapes=[pltpu.VMEM((tm, c_out_p), jnp.float32)],
        ),
        compiler_params=pltpu.CompilerParams(
            dimension_semantics=("parallel", "arbitrary"),
            vmem_limit_bytes=vmem_limit,
        ),
    )(x_pad, w1, w2)

    out = out[:m, :c_out]
    return out.reshape(*orig_shape[:-1], c_out)


def mlp_pallas(x, fc1_weight, fc2_weight, *, compute_dtype=jnp.bfloat16,
               tm=None, tk=None, vmem_limit_bytes=None):
    """Convenience wrapper (prepares weights per call; prefer prepare_mlp_weights
    + mlp_pallas_prepared so the transpose/pad/cast happens once at init)."""
    prepared = prepare_mlp_weights(fc1_weight, fc2_weight, compute_dtype)
    return mlp_pallas_prepared(x, prepared, tm=tm, tk=tk,
                               vmem_limit_bytes=vmem_limit_bytes)


def mlp_reference(x, fc1_weight, fc2_weight):
    h = _gelu_tanh(jnp.dot(x, fc1_weight.T))
    return jnp.dot(h, fc2_weight.T)


if __name__ == "__main__":
    # Small shapes consistent with the module's forward: x [batch, seq, in_features]
    batch, seq = 2, 8
    in_features, hidden_features, out_features = 32, 64, 32

    key = jax.random.PRNGKey(0)
    kx, k1, k2 = jax.random.split(key, 3)

    x = jax.random.normal(kx, (batch, seq, in_features), dtype=jnp.float32)
    # nn.Linear weights: fc1.weight is (hidden, in), fc2.weight is (out, hidden).
    fc1_w = jax.random.normal(k1, (hidden_features, in_features),
                              dtype=jnp.float32) * 0.02
    fc2_w = jax.random.normal(k2, (out_features, hidden_features),
                              dtype=jnp.float32) * 0.02

    # Hoisted weight prep (transpose / pad / bf16 cast done once).
    prepared = prepare_mlp_weights(fc1_w, fc2_w)

    y = mlp_pallas_prepared(x, prepared)
    y = jax.block_until_ready(y)

    # Convenience wrapper should match the prepared path.
    y2 = jax.block_until_ready(mlp_pallas(x, fc1_w, fc2_w))

    y_ref = mlp_reference(x, fc1_w, fc2_w)
    assert y.shape == (batch, seq, out_features)

    # bf16 MXU operands (f32 accumulation) -> compare against the f32 reference
    # with a bf16-appropriate tolerance.
    y_f32 = y.astype(jnp.float32)
    err = float(jnp.max(jnp.abs(y_f32 - y_ref)))
    scale = float(jnp.max(jnp.abs(y_ref))) + 1e-6
    assert err <= 5e-2 * scale + 2e-3, (err, scale)
    assert jnp.allclose(y_f32, y2.astype(jnp.float32), atol=1e-5, rtol=1e-5)

    print("KERNEL_OK")
</pallas_src>

<mosaic_0001>
module attributes {stable_mosaic.version = 11 : i64} {
  func.func @mlp_kernel(%arg0: i32, %arg1: i32, %arg2: memref<16x128xbf16, #tpu.memory_space<vmem>>, %arg3: memref<128x128xbf16, #tpu.memory_space<vmem>>, %arg4: memref<128x128xbf16, #tpu.memory_space<vmem>>, %arg5: memref<16x128xf32, #tpu.memory_space<vmem>>, %arg6: memref<16x128xf32, #tpu.memory_space<vmem>>) attributes {dimension_semantics = [#tpu.dimension_semantics<parallel>, #tpu.dimension_semantics<arbitrary>], iteration_bounds = array<i64: 1, 1>, scalar_prefetch = 0 : i64, scratch_operands = 1 : i64, tpu.core_type = #tpu.core_type<tc>, window_params = [{transform_indices = @transform_0, window_bounds = array<i64: 16, 128>}, {transform_indices = @transform_1, window_bounds = array<i64: 128, 128>}, {transform_indices = @transform_2, window_bounds = array<i64: 128, 128>}, {transform_indices = @transform_3, window_bounds = array<i64: 16, 128>}]} {
    %c0_i32 = arith.constant 0 : i32
    %0 = arith.cmpi eq, %arg1, %c0_i32 : i32
    %1 = arith.extui %0 : i1 to i32
    %c0_i32_0 = arith.constant 0 : i32
    %2 = arith.cmpi ne, %1, %c0_i32_0 : i32
    scf.if %2 {
      %cst_17 = arith.constant 0.000000e+00 : f32
      %28 = vector.broadcast %cst_17 : f32 to vector<16x128xf32>
      %c0_18 = arith.constant 0 : index
      %c0_19 = arith.constant 0 : index
      %29 = vector.load %arg6[%c0_18, %c0_19] : memref<16x128xf32, #tpu.memory_space<vmem>>, vector<16x128xf32>
      tpu.vector_store %arg6[%c0_18, %c0_19], %28 {strides = array<i32>} : memref<16x128xf32, #tpu.memory_space<vmem>>, vector<16x128xf32>,
    } else {
    }
    %c0 = arith.constant 0 : index
    %c0_1 = arith.constant 0 : index
    %3 = vector.load %arg2[%c0, %c0_1] : memref<16x128xbf16, #tpu.memory_space<vmem>>, vector<16x128xbf16>
    %c0_2 = arith.constant 0 : index
    %c0_3 = arith.constant 0 : index
    %4 = vector.load %arg3[%c0_2, %c0_3] : memref<128x128xbf16, #tpu.memory_space<vmem>>, vector<128x128xbf16>
    %cst = arith.constant dense<0.000000e+00> : vector<16x128xf32>
    %5 = tpu.matmul %3, %4, %cst {dimension_numbers = #tpu.dot_dimension_numbers<[1], [0], [0], [1], [0, 0, 1, 1], [], []>} : vector<16x128xbf16>, vector<128x128xbf16>, vector<16x128xf32> -> vector<16x128xf32>
    %cst_4 = arith.constant 5.000000e-01 : f32
    %6 = vector.broadcast %cst_4 : f32 to vector<16x128xf32>
    %7 = arith.mulf %6, %5 : vector<16x128xf32>
    %cst_5 = arith.constant 4.471500e-02 : f32
    %8 = vector.broadcast %cst_5 : f32 to vector<16x128xf32>
    %9 = arith.mulf %8, %5 : vector<16x128xf32>
    %10 = arith.mulf %9, %5 : vector<16x128xf32>
    %11 = arith.mulf %10, %5 : vector<16x128xf32>
    %12 = arith.addf %5, %11 : vector<16x128xf32>
    %cst_6 = arith.constant 0.797884583 : f32
    %13 = vector.broadcast %cst_6 : f32 to vector<16x128xf32>
    %14 = arith.mulf %13, %12 : vector<16x128xf32>
    %15 = math.tanh %14 : vector<16x128xf32>
    %cst_7 = arith.constant 1.000000e+00 : f32
    %16 = vector.broadcast %cst_7 : f32 to vector<16x128xf32>
    %17 = arith.addf %16, %15 : vector<16x128xf32>
    %18 = arith.mulf %7, %17 : vector<16x128xf32>
    %19 = arith.truncf %18 : vector<16x128xf32> to vector<16x128xbf16>
    %c0_8 = arith.constant 0 : index
    %c0_9 = arith.constant 0 : index
    %20 = vector.load %arg6[%c0_8, %c0_9] : memref<16x128xf32, #tpu.memory_space<vmem>>, vector<16x128xf32>
    %c0_10 = arith.constant 0 : index
    %c0_11 = arith.constant 0 : index
    %21 = vector.load %arg4[%c0_10, %c0_11] : memref<128x128xbf16, #tpu.memory_space<vmem>>, vector<128x128xbf16>
    %cst_12 = arith.constant dense<0.000000e+00> : vector<16x128xf32>
    %22 = tpu.matmul %19, %21, %cst_12 {dimension_numbers = #tpu.dot_dimension_numbers<[1], [0], [0], [1], [0, 0, 1, 1], [], []>} : vector<16x128xbf16>, vector<128x128xbf16>, vector<16x128xf32> -> vector<16x128xf32>
    %23 = arith.addf %20, %22 : vector<16x128xf32>
    %c0_13 = arith.constant 0 : index
    %c0_14 = arith.constant 0 : index
    %24 = vector.load %arg6[%c0_13, %c0_14] : memref<16x128xf32, #tpu.memory_space<vmem>>, vector<16x128xf32>
    tpu.vector_store %arg6[%c0_13, %c0_14], %23 {strides = array<i32>} : memref<16x128xf32, #tpu.memory_space<vmem>>, vector<16x128xf32>,
    %c0_i32_15 = arith.constant 0 : i32
    %25 = arith.cmpi eq, %arg1, %c0_i32_15 : i32
    %26 = arith.extui %25 : i1 to i32
    %c0_i32_16 = arith.constant 0 : i32
    %27 = arith.cmpi ne, %26, %c0_i32_16 : i32
    scf.if %27 {
      %c0_17 = arith.constant 0 : index
      %c0_18 = arith.constant 0 : index
      %28 = vector.load %arg6[%c0_17, %c0_18] : memref<16x128xf32, #tpu.memory_space<vmem>>, vector<16x128xf32>
      %c0_19 = arith.constant 0 : index
      %c0_20 = arith.constant 0 : index
      %29 = vector.load %arg5[%c0_19, %c0_20] : memref<16x128xf32, #tpu.memory_space<vmem>>, vector<16x128xf32>
      tpu.vector_store %arg5[%c0_19, %c0_20], %28 {strides = array<i32>} : memref<16x128xf32, #tpu.memory_space<vmem>>, vector<16x128xf32>,
    } else {
    }
    return
  }
  func.func @transform_0(%arg0: i32, %arg1: i32) -> (i32, i32) {
    %c0_i32 = arith.constant 0 : i32
    %c0_i32_0 = arith.constant 0 : i32
    return %arg0, %c0_i32 : i32, i32
  }
  func.func @transform_1(%arg0: i32, %arg1: i32) -> (i32, i32) {
    %c0_i32 = arith.constant 0 : i32
    %c0_i32_0 = arith.constant 0 : i32
    return %c0_i32, %arg1 : i32, i32
  }
  func.func @transform_2(%arg0: i32, %arg1: i32) -> (i32, i32) {
    %c0_i32 = arith.constant 0 : i32
    %c0_i32_0 = arith.constant 0 : i32
    return %arg1, %c0_i32 : i32, i32
  }
  func.func @transform_3(%arg0: i32, %arg1: i32) -> (i32, i32) {
    %c0_i32 = arith.constant 0 : i32
    %c0_i32_0 = arith.constant 0 : i32
    return %arg0, %c0_i32 : i32, i32
  }
}

</mosaic_0001>

<bundles_post_ra>
// kernel: tpu_custom_call.1
= control target key start
LH: loop header
LB: loop body
LE: loop exit
PB: predicated region body
PF: predicated region fallthrough
CT: control target
= control target key end

     0   :  { %8 = vsyncpa [#allocation4], 0  ;;  %s625_s0 = inlined_call_operand.hbm [shape: bf16[16,128], index: 0, kind: input, shape index: {}]   ;;  %s626_s1 = inlined_call_operand.hbm [shape: bf16[128,128], index: 1, kind: input, shape index: {}]   ;;  %s627_s2 = inlined_call_operand.hbm [shape: bf16[128,128], index: 2, kind: input, shape index: {}]   ;;  %s628_s3 = inlined_call_operand.hbm [shape: f32[16,128], index: 3, kind: output, shape index: {}]  }
   0x1   :  { %9 = vsyncpa [#allocation7], 0 }
   0x2   :  { %10 = vsyncpa [#allocation5], 0  ;;  %s531_s12 = smov [#allocation6]   ;;  %s532_s14 = smov [#allocation3]  }
   0x3   :  { %s28_s13 = sshll.u32 %s531_s12, 4  ;;  %s16_s15 = sshll.u32 %s532_s14, 4  ;;  %s29_s13 = int_to_ptr.vmem [resolvable:$true] %s28_s13  ;;  %s561_s15 = int_to_ptr.vmem [resolvable:$true] %s16_s15 }
   0x4   :  { %s437_s18 = scalar_lea.hbm %s626_s1, 1024 }
   0x5   :  { %p438_p0 = scmp.ne.s32.totalorder %s626_s1, %s437_s18  ;;  %p441_p1 = scmp.lt.u32.totalorder %s437_s18, %s626_s1 }
   0x7   :  { %p443_p2 = pnand %p441_p1, %p438_p0 }
   0x9   :  { %446 = shalt.err (!%p443_p2)
}
   0xa   :  { %s447_s23 = scalar_lea.vmem %s29_s13, 1024  ;;  %p452_p4 = scmp.lt.s32.totalorder %s29_s13, %s29_s13 }
   0xb   :  { %p448_p3 = scmp.ne.s32.totalorder %s29_s13, %s447_s23  ;;  %p453_p5 = scmp.lt.s32.totalorder %s447_s23, %s447_s23 }
   0xd   :  { %p454_p6 = por %p453_p5, %p452_p4 }
   0xf   :  { %p455_p7 = pnand %p454_p6, %p448_p3 }
  0x11   :  { %458 = shalt.err (!%p455_p7)
}
  0x12   :  { %s533_s24 = smov 64   ;;  %s534_s25 = smov 4  }
  0x13   :  { %34 = dma.hbm_to_vmem [thread:$0]  %s626_s1, 1024, %s29_s13, [#allocation7], %s533_s24, %s533_s24, %s534_s25  }
  0x14   :  { %s459_s30 = scalar_lea.hbm %s625_s0, 128 }
  0x15   :  { %p460_p8 = scmp.ne.s32.totalorder %s625_s0, %s459_s30  ;;  %p463_p9 = scmp.lt.u32.totalorder %s459_s30, %s625_s0 }
  0x17   :  { %p465_p10 = pnand %p463_p9, %p460_p8 }
  0x19   :  { %468 = shalt.err (!%p465_p10)
}
  0x1a   :  { %s469_s8 = scalar_lea.vmem %s561_s15, 128  ;;  %p474_p12 = scmp.lt.s32.totalorder %s561_s15, %s561_s15 }
  0x1b   :  { %p470_p11 = scmp.ne.s32.totalorder %s561_s15, %s469_s8  ;;  %p475_p13 = scmp.lt.s32.totalorder %s469_s8, %s469_s8 }
  0x1d   :  { %p476_p0 = por %p475_p13, %p474_p12 }
  0x1f   :  { %p477_p1 = pnand %p476_p0, %p470_p11 }
  0x21   :  { %480 = shalt.err (!%p477_p1)
}
  0x22   :  { %22 = dma.hbm_to_vmem [thread:$0]  %s625_s0, 128, %s561_s15, [#allocation4], %s533_s24, %s533_s24, %s534_s25  }
  0x23   :  { %s535_s10 = smov [#allocation8]   ;;  %s481_s14 = scalar_lea.hbm %s627_s2, 1024 }
  0x24   :  { %s40_s11 = sshll.u32 %s535_s10, 4  ;;  %p482_p2 = scmp.ne.s32.totalorder %s627_s2, %s481_s14  ;;  %s41_s11 = int_to_ptr.vmem [resolvable:$true] %s40_s11 }
  0x25   :  { %p485_p3 = scmp.lt.u32.totalorder %s481_s14, %s627_s2 }
  0x27   :  { %p487_p4 = pnand %p485_p3, %p482_p2 }
  0x29   :  { %490 = shalt.err (!%p487_p4)
}
  0x2a   :  { %s491_s20 = scalar_lea.vmem %s41_s11, 1024  ;;  %p496_p6 = scmp.lt.s32.totalorder %s41_s11, %s41_s11 }
  0x2b   :  { %p492_p5 = scmp.ne.s32.totalorder %s41_s11, %s491_s20  ;;  %p497_p7 = scmp.lt.s32.totalorder %s491_s20, %s491_s20 }
  0x2d   :  { %p498_p8 = por %p497_p7, %p496_p6 }
  0x2f   :  { %p499_p9 = pnand %p498_p8, %p492_p5 }
  0x31   :  { %502 = shalt.err (!%p499_p9)
}
  0x32   :  { %46 = dma.hbm_to_vmem [thread:$0]  %s627_s2, 1024, %s41_s11, [#allocation7], %s533_s24, %s533_s24, %s534_s25  }
  0x33   :  { %525 = dma.done.wait [#allocation4], 128  }
  0x34   :  { %526 = vsyncadd [#allocation4], 4294967168 }
  0x35   :  { %527 = dma.done.wait [#allocation7], 2048  }
  0x36   :  { %528 = vsyncadd [#allocation7], 4294965248  ;;  %v536_v0 = vmov 0.0   ;;  %vm537_vm0 = vmmov 0   ;;  %v416_v1 = vld [vmem:[#allocation6] sm:$0xff]   ;;  %v417_v2 = vld [vmem:[#allocation6 + $0x8] sm:$0xff]  }
  0x37   :  { %366 = vmatprep.subr.bf16.mxu0 %v536_v0  ;;  %382 = vmatprep.mubr.msk.bf16.mxu0 %vm537_vm0, %v536_v0  ;;  %v418_v3 = vld [vmem:[#allocation6 + $0x10] sm:$0xff]   ;;  %v419_v4 = vld [vmem:[#allocation6 + $0x18] sm:$0xff]   ;;  %v425_v5 = vld [vmem:[#allocation8] sm:$0xff]   ;;  %s538_s2 = smov [#allocation9]  }
  0x38   :  { %386 = vmatprep.subr.bf16.mxu1 %v536_v0  ;;  %402 = vmatprep.mubr.msk.bf16.mxu1 %vm537_vm0, %v536_v0  ;;  %v420_v6 = vld [vmem:[#allocation6 + $0x20] sm:$0xff]   ;;  %v421_v7 = vld [vmem:[#allocation6 + $0x28] sm:$0xff]   ;;  %v422_v8 = vld [vmem:[#allocation6 + $0x30] sm:$0xff]   ;;  %s318_s21 = sshll.u32 %s538_s2, 4  ;;  %s319_s21 = int_to_ptr.vmem [resolvable:$true] %s318_s21 }
  0x39   :  { %367 = vmatpush3.bf16.msra.mxu0 %v416_v1  ;;  %387 = vmatpush3.bf16.msra.mxu1 %v425_v5  ;;  %v423_v9 = vld [vmem:[#allocation6 + $0x38] sm:$0xff]   ;;  %v426_v11 = vld [vmem:[#allocation8 + $0x8] sm:$0xff]   ;;  %v427_v12 = vld [vmem:[#allocation8 + $0x10] sm:$0xff]   ;;  %s503_s22 = scalar_lea.vmem %s319_s21, 256  ;;  %p508_p11 = scmp.lt.s32.totalorder %s319_s21, %s319_s21 }
  0x3a   :  { %368 = vmatprep.subr.bf16.mxu0 %v536_v0  ;;  %388 = vmatprep.subr.bf16.mxu1 %v536_v0  ;;  %v424_v10 = vld [vmem:[#allocation3] sm:$0xff]   ;;  %v429_v14 = vld [vmem:[#allocation8 + $0x20] sm:$0xff]   ;;  %v430_v15 = vld [vmem:[#allocation8 + $0x28] sm:$0xff]   ;;  %p504_p10 = scmp.ne.s32.totalorder %s319_s21, %s503_s22  ;;  %p509_p12 = scmp.lt.s32.totalorder %s503_s22, %s503_s22 }
  0x3b   :  { %v428_v13 = vld [vmem:[#allocation8 + $0x18] sm:$0xff]   ;;  %v431_v16 = vld [vmem:[#allocation8 + $0x30] sm:$0xff]  }
  0x3c   :  { %v432_v17 = vld [vmem:[#allocation8 + $0x38] sm:$0xff]   ;;  %p510_p13 = por %p509_p12, %p508_p11 }
  0x3d   :  { %369 = vmatpush3.bf16.msra.mxu0 %v417_v2  ;;  %389 = vmatpush3.bf16.msra.mxu1 %v426_v11 }
  0x3e   :  { %370 = vmatprep.subr.bf16.mxu0 %v536_v0  ;;  %390 = vmatprep.subr.bf16.mxu1 %v536_v0  ;;  %p511_p0 = pnand %p510_p13, %p504_p10 }
  0x41   :  { %371 = vmatpush3.bf16.msra.mxu0 %v418_v3  ;;  %391 = vmatpush3.bf16.msra.mxu1 %v427_v12 }
  0x42   :  { %372 = vmatprep.subr.bf16.mxu0 %v536_v0  ;;  %392 = vmatprep.subr.bf16.mxu1 %v536_v0 }
  0x45   :  { %373 = vmatpush3.bf16.msra.mxu0 %v419_v4  ;;  %393 = vmatpush3.bf16.msra.mxu1 %v428_v13 }
  0x46   :  { %374 = vmatprep.subr.bf16.mxu0 %v536_v0  ;;  %394 = vmatprep.subr.bf16.mxu1 %v536_v0 }
  0x49   :  { %375 = vmatpush3.bf16.msra.mxu0 %v420_v6  ;;  %395 = vmatpush3.bf16.msra.mxu1 %v429_v14 }
  0x4a   :  { %376 = vmatprep.subr.bf16.mxu0 %v536_v0  ;;  %396 = vmatprep.subr.bf16.mxu1 %v536_v0 }
  0x4d   :  { %377 = vmatpush3.bf16.msra.mxu0 %v421_v7  ;;  %397 = vmatpush3.bf16.msra.mxu1 %v430_v15 }
  0x4e   :  { %378 = vmatprep.subr.bf16.mxu0 %v536_v0  ;;  %398 = vmatprep.subr.bf16.mxu1 %v536_v0 }
  0x51   :  { %379 = vmatpush3.bf16.msra.mxu0 %v422_v8  ;;  %399 = vmatpush3.bf16.msra.mxu1 %v431_v16 }
  0x52   :  { %380 = vmatprep.subr.bf16.mxu0 %v536_v0  ;;  %400 = vmatprep.subr.bf16.mxu1 %v536_v0 }
  0x55   :  { %381 = vmatpush3.bf16.msra.mxu0 %v423_v9  ;;  %401 = vmatpush3.bf16.msra.mxu1 %v432_v17 }
  0x58   :  { %383 = vmatmul.mubr.bf16.vlgmr.msra.gmra.mrb[0].mxu0 %v424_v10 }
 0x12b   :  { %v169_v18 = vpop.f32.mrb[0].mxu0 }
 0x12c   :  { %v178_v19 = vmul.f32 0.044715, %v169_v18  ;;  %v384_v20 = vpop.f32.mrb[1].mxu0  ;;  %v176_v35 = vmul.f32 0.5, %v169_v18 }
 0x12d   :  { %v172_v21 = vpop.f32.mrb[2].mxu0 }
 0x12e   :  { %v180_v22 = vmul.f32 %v178_v19, %v169_v18  ;;  %v179_v23 = vmul.f32 0.044715, %v172_v21  ;;  %v385_v24 = vpop.f32.mrb[3].mxu0  ;;  %v177_v36 = vmul.f32 0.5, %v172_v21 }
 0x130   :  { %v182_v25 = vmul.f32 %v180_v22, %v169_v18  ;;  %v181_v26 = vmul.f32 %v179_v23, %v172_v21 }
 0x132   :  { %v184_v27 = vadd.f32 %v182_v25, %v169_v18  ;;  %v183_v28 = vmul.f32 %v181_v26, %v172_v21 }
 0x134   :  { %v186_v29 = vmul.f32 0.7978846, %v184_v27  ;;  %v185_v30 = vadd.f32 %v183_v28, %v172_v21 }
 0x136   :  { %433 = vtanh.f32 %v186_v29  ;;  %v187_v31 = vmul.f32 0.7978846, %v185_v30 }
 0x138   :  { %435 = vtanh.f32 %v187_v31 }
 0x140   :  { %v434_v32 = vpop.eup %433 }
 0x141   :  { %v190_v33 = vadd.f32 1.0, %v434_v32 }
 0x142   :  { %v436_v34 = vpop.eup %435 }
 0x143   :  { %v191_v37 = vadd.f32 1.0, %v436_v34  ;;  %v192_v38 = vmul.f32 %v190_v33, %v176_v35 }
 0x145   :  { %v193_v39 = vmul.f32 %v191_v37, %v177_v36 }
 0x147   :  { %v194_v40 = vpack.c.bf16 %v193_v39, %v192_v38 }
 0x149   :  { %403 = vmatmul.mubr.bf16.vlgmr.msra.gmra.mrb[0].mxu1 %v194_v40 }
 0x21c   :  { %v295_v41 = vpop.f32.mrb[0].mxu1 }
 0x21d   :  { %311 = vst [vmem:[#allocation9] sm:$0xff] %v295_v41  ;;  %v404_v42 = vpop.f32.mrb[1].mxu1 }
 0x21e   :  { %v298_v43 = vpop.f32.mrb[2].mxu1 }
 0x21f   :  { %312 = vst [vmem:[#allocation9 + $0x8] sm:$0xff] %v298_v43  ;;  %v405_v44 = vpop.f32.mrb[3].mxu1 }
 0x220   :  { %514 = shalt.err (!%p511_p0)
}
 0x221   :  { %s515_s25 = scalar_lea.hbm %s628_s3, 256 }
 0x222   :  { %p516_p1 = scmp.ne.s32.totalorder %s628_s3, %s515_s25  ;;  %p519_p2 = scmp.lt.u32.totalorder %s515_s25, %s628_s3 }
 0x224   :  { %p521_p3 = pnand %p519_p2, %p516_p1 }
 0x226   :  { %524 = shalt.err (!%p521_p3)
}
 0x227   :  { %s539_s30 = smov 128   ;;  %s540_s4 = smov 8  }
 0x228   :  { %324 = dma.vmem_to_hbm [thread:$0]  %s319_s21, 256, %s628_s3, [#allocation5], %s539_s30, %s539_s30, %s540_s4  }
 0x229   :  { %529 = dma.done.wait [#allocation5], 256  }
 0x22a   :  { %530 = vsyncadd [#allocation5], 4294967040 }
 0x22b   :  { %328 = vsyncpa [#allocation4], 1 }
 0x22c   :  { %329 = vsyncpa [#allocation7], 1 }
 0x22d   :  { %330 = vsyncpa [#allocation5], 1 }

</bundles_post_ra>
